<compile_context>
chip_gen: v7x
topology: tpu7x:2x2x1
jax: 0.10.0
libtpu: 0.0.40
codegen_flags: <defaults>
</compile_context>

<pallas_src>
import jax
import jax.numpy as jnp
from jax.experimental import pallas as pl
from jax.experimental.pallas import tpu as pltpu

INPUT_SIZE = 3
HIDDEN_SIZE = 32
NUM_LAYERS = 1  # kernel assumes a single layer (as in the module config)


def _rnn_kernel(x_ref, wih_ref, whh_ref, b_ref, wfc_ref, bfc_ref,
                out_ref, hn_ref):
    B, T, I = x_ref.shape
    H = whh_ref.shape[1]

    # --- Pre-pass: input projection for ALL timesteps in one matmul (hoisted) ---
    # (B*T, I) @ (I, H) + (1, H)  ->  (B*T, H), rows ordered b-major / t-minor.
    xw = jnp.dot(x_ref[...].reshape(B * T, I), wih_ref[...],
                 preferred_element_type=jnp.float32) + b_ref[...]
    xw = xw.reshape(B, T, H)  # (B, T, H) — same memory layout, free reshape

    # --- Serial recurrence: one tiny matmul + tanh per step (critical path) ---
    whh = whh_ref[...]
    h = jnp.zeros((B, H), jnp.float32)
    hs = []
    for t in range(T):  # static unroll (T small & known at trace time)
        h = jnp.tanh(
            xw[:, t, :]
            + jnp.dot(h, whh, preferred_element_type=jnp.float32)
        )
        hs.append(h)

    # --- Lane-dense output store: (B, T*H) slab, single unmasked store ---
    # out[b, t*H + k] = h_t[b, k]  ==  reshape to (B, T, H) in the wrapper.
    out_ref[...] = jnp.concatenate(hs, axis=1).astype(out_ref.dtype)

    # --- Epilogue: fc on the final hidden state (h_n) ---
    hn_ref[...] = (
        jnp.dot(h, wfc_ref[...], preferred_element_type=jnp.float32)
        + bfc_ref[...]
    ).astype(hn_ref.dtype)


def vanilla_rnn_forward(x, params):
    """x: (B, T, I) float32 (batch_first, like PyTorch nn.RNN).

    Returns (out (B, T, H), fc(h_n) (B, 2)) — matching VanillaRNN.forward."""
    B, T, I = x.shape
    H = HIDDEN_SIZE

    # Pre-transpose weights; fuse the two RNN biases (glue, not hot path).
    wih_t = params["w_ih"].T                               # (I, H)
    whh_t = params["w_hh"].T                               # (H, H)
    b = (params["b_ih"] + params["b_hh"]).reshape(1, H)    # (1, H)
    wfc_t = params["w_fc"].T                               # (H, 2)
    bfc = params["b_fc"].reshape(1, 2)                     # (1, 2)

    grid_spec = pltpu.PrefetchScalarGridSpec(
        num_scalar_prefetch=0,
        grid=(1,),  # single grid point: whole problem in one kernel invocation
        in_specs=[
            pl.BlockSpec((B, T, I), lambda i: (0, 0, 0)),  # x (batch_first, no transpose)
            pl.BlockSpec((I, H), lambda i: (0, 0)),        # W_ih^T
            pl.BlockSpec((H, H), lambda i: (0, 0)),        # W_hh^T
            pl.BlockSpec((1, H), lambda i: (0, 0)),        # b_ih + b_hh
            pl.BlockSpec((H, 2), lambda i: (0, 0)),        # W_fc^T
            pl.BlockSpec((1, 2), lambda i: (0, 0)),        # b_fc
        ],
        out_specs=[
            pl.BlockSpec((B, T * H), lambda i: (0, 0)),    # lane-dense out slab
            pl.BlockSpec((B, 2), lambda i: (0, 0)),        # fc(h_n)
        ],
    )

    out_flat, hn_fc = pl.pallas_call(
        _rnn_kernel,
        out_shape=(
            jax.ShapeDtypeStruct((B, T * H), jnp.float32),
            jax.ShapeDtypeStruct((B, 2), jnp.float32),
        ),
        grid_spec=grid_spec,
        compiler_params=pltpu.CompilerParams(
            dimension_semantics=("arbitrary",),
        ),
    )(x, wih_t, whh_t, b, wfc_t, bfc)

    out = out_flat.reshape(B, T, H)  # free row-major reshape, stays batch_first
    return out, hn_fc


def init_params(key):
    """Deterministic init matching PyTorch shapes: W_ih (H,I), W_hh (H,H), biases (H,), fc (2,H)/(2,)."""
    H, I = HIDDEN_SIZE, INPUT_SIZE
    k = jax.random.split(key, 6)
    bound = 1.0 / jnp.sqrt(H)
    return {
        "w_ih": jax.random.uniform(k[0], (H, I), jnp.float32, -bound, bound),
        "w_hh": jax.random.uniform(k[1], (H, H), jnp.float32, -bound, bound),
        "b_ih": jax.random.uniform(k[2], (H,), jnp.float32, -bound, bound),
        "b_hh": jax.random.uniform(k[3], (H,), jnp.float32, -bound, bound),
        "w_fc": jax.random.uniform(k[4], (2, H), jnp.float32, -bound, bound),
        "b_fc": jax.random.uniform(k[5], (2,), jnp.float32, -bound, bound),
    }


def _reference_forward(x, params):
    """Pure-JAX reference of the PyTorch forward (tanh RNN + fc on final hidden)."""
    B, T, I = x.shape
    H = HIDDEN_SIZE

    def step(h, x_t):
        h_new = jnp.tanh(x_t @ params["w_ih"].T + params["b_ih"]
                         + h @ params["w_hh"].T + params["b_hh"])
        return h_new, h_new

    h0 = jnp.zeros((B, H), jnp.float32)
    h_n, out_tm = jax.lax.scan(step, h0, jnp.transpose(x, (1, 0, 2)))
    out = jnp.transpose(out_tm, (1, 0, 2))
    hn_fc = h_n @ params["w_fc"].T + params["b_fc"]
    return out, hn_fc


if __name__ == "__main__":
    key = jax.random.PRNGKey(0)
    k_param, k_x = jax.random.split(key)

    batch, seq_len = 2, 8
    params = init_params(k_param)
    x = jax.random.normal(k_x, (batch, seq_len, INPUT_SIZE), jnp.float32)

    out, hn_fc = vanilla_rnn_forward(x, params)
    out = jax.block_until_ready(out)
    hn_fc = jax.block_until_ready(hn_fc)

    # Sanity-check against the pure-JAX reference.
    ref_out, ref_hn = _reference_forward(x, params)
    assert out.shape == (batch, seq_len, HIDDEN_SIZE)
    assert hn_fc.shape == (batch, 2)
    assert jnp.allclose(out, ref_out, atol=1e-5, rtol=1e-5)
    assert jnp.allclose(hn_fc, ref_hn, atol=1e-5, rtol=1e-5)

    print("KERNEL_OK")
</pallas_src>

<mosaic_0001>
module attributes {stable_mosaic.version = 11 : i64} {
  func.func @_rnn_kernel(%arg0: i32, %arg1: memref<2x8x3xf32, #tpu.memory_space<vmem>>, %arg2: memref<3x32xf32, #tpu.memory_space<vmem>>, %arg3: memref<32x32xf32, #tpu.memory_space<vmem>>, %arg4: memref<1x32xf32, #tpu.memory_space<vmem>>, %arg5: memref<32x2xf32, #tpu.memory_space<vmem>>, %arg6: memref<1x2xf32, #tpu.memory_space<vmem>>, %arg7: memref<2x256xf32, #tpu.memory_space<vmem>>, %arg8: memref<2x2xf32, #tpu.memory_space<vmem>>) attributes {dimension_semantics = [#tpu.dimension_semantics<arbitrary>], iteration_bounds = array<i64: 1>, scalar_prefetch = 0 : i64, scratch_operands = 0 : i64, tpu.core_type = #tpu.core_type<tc>, window_params = [{pipeline_mode = #tpu.pipeline_mode<synchronous>, transform_indices = @transform_0, window_bounds = array<i64: 2, 8, 3>}, {pipeline_mode = #tpu.pipeline_mode<synchronous>, transform_indices = @transform_1, window_bounds = array<i64: 3, 32>}, {pipeline_mode = #tpu.pipeline_mode<synchronous>, transform_indices = @transform_2, window_bounds = array<i64: 32, 32>}, {pipeline_mode = #tpu.pipeline_mode<synchronous>, transform_indices = @transform_3, window_bounds = array<i64: 1, 32>}, {pipeline_mode = #tpu.pipeline_mode<synchronous>, transform_indices = @transform_4, window_bounds = array<i64: 32, 2>}, {pipeline_mode = #tpu.pipeline_mode<synchronous>, transform_indices = @transform_5, window_bounds = array<i64: 1, 2>}, {pipeline_mode = #tpu.pipeline_mode<synchronous>, transform_indices = @transform_6, window_bounds = array<i64: 2, 256>}, {pipeline_mode = #tpu.pipeline_mode<synchronous>, transform_indices = @transform_7, window_bounds = array<i64: 2, 2>}]} {
    %c0 = arith.constant 0 : index
    %c0_0 = arith.constant 0 : index
    %c0_1 = arith.constant 0 : index
    %0 = vector.load %arg1[%c0, %c0_0, %c0_1] : memref<2x8x3xf32, #tpu.memory_space<vmem>>, vector<2x8x3xf32>
    %1 = vector.shape_cast %0 : vector<2x8x3xf32> to vector<16x3xf32>
    %c0_2 = arith.constant 0 : index
    %c0_3 = arith.constant 0 : index
    %2 = vector.load %arg2[%c0_2, %c0_3] : memref<3x32xf32, #tpu.memory_space<vmem>>, vector<3x32xf32>
    %cst = arith.constant dense<0.000000e+00> : vector<16x32xf32>
    %3 = tpu.matmul %1, %2, %cst {dimension_numbers = #tpu.dot_dimension_numbers<[1], [0], [0], [1], [0, 0, 1, 1], [], []>} : vector<16x3xf32>, vector<3x32xf32>, vector<16x32xf32> -> vector<16x32xf32>
    %c0_4 = arith.constant 0 : index
    %c0_5 = arith.constant 0 : index
    %4 = vector.load %arg4[%c0_4, %c0_5] : memref<1x32xf32, #tpu.memory_space<vmem>>, vector<1x32xf32>
    %5 = vector.broadcast %4 : vector<1x32xf32> to vector<16x32xf32>
    %6 = arith.addf %3, %5 : vector<16x32xf32>
    %7 = vector.shape_cast %6 : vector<16x32xf32> to vector<2x8x32xf32>
    %c0_6 = arith.constant 0 : index
    %c0_7 = arith.constant 0 : index
    %8 = vector.load %arg3[%c0_6, %c0_7] : memref<32x32xf32, #tpu.memory_space<vmem>>, vector<32x32xf32>
    %cst_8 = arith.constant 0.000000e+00 : f32
    %9 = vector.broadcast %cst_8 : f32 to vector<2x32xf32>
    %10 = vector.extract_strided_slice %7 {offsets = [0, 0, 0], sizes = [2, 1, 32], strides = [1, 1, 1]} : vector<2x8x32xf32> to vector<2x1x32xf32>
    %11 = vector.shape_cast %10 : vector<2x1x32xf32> to vector<2x32xf32>
    %cst_9 = arith.constant dense<0.000000e+00> : vector<2x32xf32>
    %12 = tpu.matmul %9, %8, %cst_9 {dimension_numbers = #tpu.dot_dimension_numbers<[1], [0], [0], [1], [0, 0, 1, 1], [], []>} : vector<2x32xf32>, vector<32x32xf32>, vector<2x32xf32> -> vector<2x32xf32>
    %13 = arith.addf %11, %12 : vector<2x32xf32>
    %14 = math.tanh %13 : vector<2x32xf32>
    %15 = vector.extract_strided_slice %7 {offsets = [0, 1, 0], sizes = [2, 1, 32], strides = [1, 1, 1]} : vector<2x8x32xf32> to vector<2x1x32xf32>
    %16 = vector.shape_cast %15 : vector<2x1x32xf32> to vector<2x32xf32>
    %cst_10 = arith.constant dense<0.000000e+00> : vector<2x32xf32>
    %17 = tpu.matmul %14, %8, %cst_10 {dimension_numbers = #tpu.dot_dimension_numbers<[1], [0], [0], [1], [0, 0, 1, 1], [], []>} : vector<2x32xf32>, vector<32x32xf32>, vector<2x32xf32> -> vector<2x32xf32>
    %18 = arith.addf %16, %17 : vector<2x32xf32>
    %19 = math.tanh %18 : vector<2x32xf32>
    %20 = vector.extract_strided_slice %7 {offsets = [0, 2, 0], sizes = [2, 1, 32], strides = [1, 1, 1]} : vector<2x8x32xf32> to vector<2x1x32xf32>
    %21 = vector.shape_cast %20 : vector<2x1x32xf32> to vector<2x32xf32>
    %cst_11 = arith.constant dense<0.000000e+00> : vector<2x32xf32>
    %22 = tpu.matmul %19, %8, %cst_11 {dimension_numbers = #tpu.dot_dimension_numbers<[1], [0], [0], [1], [0, 0, 1, 1], [], []>} : vector<2x32xf32>, vector<32x32xf32>, vector<2x32xf32> -> vector<2x32xf32>
    %23 = arith.addf %21, %22 : vector<2x32xf32>
    %24 = math.tanh %23 : vector<2x32xf32>
    %25 = vector.extract_strided_slice %7 {offsets = [0, 3, 0], sizes = [2, 1, 32], strides = [1, 1, 1]} : vector<2x8x32xf32> to vector<2x1x32xf32>
    %26 = vector.shape_cast %25 : vector<2x1x32xf32> to vector<2x32xf32>
    %cst_12 = arith.constant dense<0.000000e+00> : vector<2x32xf32>
    %27 = tpu.matmul %24, %8, %cst_12 {dimension_numbers = #tpu.dot_dimension_numbers<[1], [0], [0], [1], [0, 0, 1, 1], [], []>} : vector<2x32xf32>, vector<32x32xf32>, vector<2x32xf32> -> vector<2x32xf32>
    %28 = arith.addf %26, %27 : vector<2x32xf32>
    %29 = math.tanh %28 : vector<2x32xf32>
    %30 = vector.extract_strided_slice %7 {offsets = [0, 4, 0], sizes = [2, 1, 32], strides = [1, 1, 1]} : vector<2x8x32xf32> to vector<2x1x32xf32>
    %31 = vector.shape_cast %30 : vector<2x1x32xf32> to vector<2x32xf32>
    %cst_13 = arith.constant dense<0.000000e+00> : vector<2x32xf32>
    %32 = tpu.matmul %29, %8, %cst_13 {dimension_numbers = #tpu.dot_dimension_numbers<[1], [0], [0], [1], [0, 0, 1, 1], [], []>} : vector<2x32xf32>, vector<32x32xf32>, vector<2x32xf32> -> vector<2x32xf32>
    %33 = arith.addf %31, %32 : vector<2x32xf32>
    %34 = math.tanh %33 : vector<2x32xf32>
    %35 = vector.extract_strided_slice %7 {offsets = [0, 5, 0], sizes = [2, 1, 32], strides = [1, 1, 1]} : vector<2x8x32xf32> to vector<2x1x32xf32>
    %36 = vector.shape_cast %35 : vector<2x1x32xf32> to vector<2x32xf32>
    %cst_14 = arith.constant dense<0.000000e+00> : vector<2x32xf32>
    %37 = tpu.matmul %34, %8, %cst_14 {dimension_numbers = #tpu.dot_dimension_numbers<[1], [0], [0], [1], [0, 0, 1, 1], [], []>} : vector<2x32xf32>, vector<32x32xf32>, vector<2x32xf32> -> vector<2x32xf32>
    %38 = arith.addf %36, %37 : vector<2x32xf32>
    %39 = math.tanh %38 : vector<2x32xf32>
    %40 = vector.extract_strided_slice %7 {offsets = [0, 6, 0], sizes = [2, 1, 32], strides = [1, 1, 1]} : vector<2x8x32xf32> to vector<2x1x32xf32>
    %41 = vector.shape_cast %40 : vector<2x1x32xf32> to vector<2x32xf32>
    %cst_15 = arith.constant dense<0.000000e+00> : vector<2x32xf32>
    %42 = tpu.matmul %39, %8, %cst_15 {dimension_numbers = #tpu.dot_dimension_numbers<[1], [0], [0], [1], [0, 0, 1, 1], [], []>} : vector<2x32xf32>, vector<32x32xf32>, vector<2x32xf32> -> vector<2x32xf32>
    %43 = arith.addf %41, %42 : vector<2x32xf32>
    %44 = math.tanh %43 : vector<2x32xf32>
    %45 = vector.extract_strided_slice %7 {offsets = [0, 7, 0], sizes = [2, 1, 32], strides = [1, 1, 1]} : vector<2x8x32xf32> to vector<2x1x32xf32>
    %46 = vector.shape_cast %45 : vector<2x1x32xf32> to vector<2x32xf32>
    %cst_16 = arith.constant dense<0.000000e+00> : vector<2x32xf32>
    %47 = tpu.matmul %44, %8, %cst_16 {dimension_numbers = #tpu.dot_dimension_numbers<[1], [0], [0], [1], [0, 0, 1, 1], [], []>} : vector<2x32xf32>, vector<32x32xf32>, vector<2x32xf32> -> vector<2x32xf32>
    %48 = arith.addf %46, %47 : vector<2x32xf32>
    %49 = math.tanh %48 : vector<2x32xf32>
    %50 = tpu.concatenate %14, %19, %24, %29, %34, %39, %44, %49 in 1 : vector<2x32xf32>, vector<2x32xf32>, vector<2x32xf32>, vector<2x32xf32>, vector<2x32xf32>, vector<2x32xf32>, vector<2x32xf32>, vector<2x32xf32> -> vector<2x256xf32>
    %c0_17 = arith.constant 0 : index
    %c0_18 = arith.constant 0 : index
    %51 = vector.load %arg7[%c0_17, %c0_18] : memref<2x256xf32, #tpu.memory_space<vmem>>, vector<2x256xf32>
    tpu.vector_store %arg7[%c0_17, %c0_18], %50 {strides = array<i32>} : memref<2x256xf32, #tpu.memory_space<vmem>>, vector<2x256xf32>,
    %c0_19 = arith.constant 0 : index
    %c0_20 = arith.constant 0 : index
    %52 = vector.load %arg5[%c0_19, %c0_20] : memref<32x2xf32, #tpu.memory_space<vmem>>, vector<32x2xf32>
    %cst_21 = arith.constant dense<0.000000e+00> : vector<2x2xf32>
    %53 = tpu.matmul %49, %52, %cst_21 {dimension_numbers = #tpu.dot_dimension_numbers<[1], [0], [0], [1], [0, 0, 1, 1], [], []>} : vector<2x32xf32>, vector<32x2xf32>, vector<2x2xf32> -> vector<2x2xf32>
    %c0_22 = arith.constant 0 : index
    %c0_23 = arith.constant 0 : index
    %54 = vector.load %arg6[%c0_22, %c0_23] : memref<1x2xf32, #tpu.memory_space<vmem>>, vector<1x2xf32>
    %55 = vector.broadcast %54 : vector<1x2xf32> to vector<2x2xf32>
    %56 = arith.addf %53, %55 : vector<2x2xf32>
    %c0_24 = arith.constant 0 : index
    %c0_25 = arith.constant 0 : index
    %57 = vector.load %arg8[%c0_24, %c0_25] : memref<2x2xf32, #tpu.memory_space<vmem>>, vector<2x2xf32>
    tpu.vector_store %arg8[%c0_24, %c0_25], %56 {strides = array<i32>} : memref<2x2xf32, #tpu.memory_space<vmem>>, vector<2x2xf32>,
    return
  }
  func.func @transform_0(%arg0: i32) -> (i32, i32, i32) {
    %c0_i32 = arith.constant 0 : i32
    %c0_i32_0 = arith.constant 0 : i32
    %c0_i32_1 = arith.constant 0 : i32
    %c0_i32_2 = arith.constant 0 : i32
    return %c0_i32, %c0_i32_0, %c0_i32_1 : i32, i32, i32
  }
  func.func @transform_1(%arg0: i32) -> (i32, i32) {
    %c0_i32 = arith.constant 0 : i32
    %c0_i32_0 = arith.constant 0 : i32
    %c0_i32_1 = arith.constant 0 : i32
    return %c0_i32, %c0_i32_0 : i32, i32
  }
  func.func @transform_2(%arg0: i32) -> (i32, i32) {
    %c0_i32 = arith.constant 0 : i32
    %c0_i32_0 = arith.constant 0 : i32
    %c0_i32_1 = arith.constant 0 : i32
    return %c0_i32, %c0_i32_0 : i32, i32
  }
  func.func @transform_3(%arg0: i32) -> (i32, i32) {
    %c0_i32 = arith.constant 0 : i32
    %c0_i32_0 = arith.constant 0 : i32
    %c0_i32_1 = arith.constant 0 : i32
    return %c0_i32, %c0_i32_0 : i32, i32
  }
  func.func @transform_4(%arg0: i32) -> (i32, i32) {
    %c0_i32 = arith.constant 0 : i32
    %c0_i32_0 = arith.constant 0 : i32
    %c0_i32_1 = arith.constant 0 : i32
    return %c0_i32, %c0_i32_0 : i32, i32
  }
  func.func @transform_5(%arg0: i32) -> (i32, i32) {
    %c0_i32 = arith.constant 0 : i32
    %c0_i32_0 = arith.constant 0 : i32
    %c0_i32_1 = arith.constant 0 : i32
    return %c0_i32, %c0_i32_0 : i32, i32
  }
  func.func @transform_6(%arg0: i32) -> (i32, i32) {
    %c0_i32 = arith.constant 0 : i32
    %c0_i32_0 = arith.constant 0 : i32
    %c0_i32_1 = arith.constant 0 : i32
    return %c0_i32, %c0_i32_0 : i32, i32
  }
  func.func @transform_7(%arg0: i32) -> (i32, i32) {
    %c0_i32 = arith.constant 0 : i32
    %c0_i32_0 = arith.constant 0 : i32
    %c0_i32_1 = arith.constant 0 : i32
    return %c0_i32, %c0_i32_0 : i32, i32
  }
}

</mosaic_0001>

<bundles_post_ra>
// kernel: tpu_custom_call.1
= control target key start
LH: loop header
LB: loop body
LE: loop exit
PB: predicated region body
PF: predicated region fallthrough
CT: control target
= control target key end

     0   :  { %13 = vsyncpa [#allocation3], 0  ;;  %vm44_vm0 = vcmask 1042432   ;;  %v1275_v3 = vmov 0.0|0.0   ;;  %vm37_vm1 = vcmask 23552   ;;  %s1495_s0 = inlined_call_operand.vmem [shape: f32[2,8,3], index: 0, kind: input, shape index: {}]   ;;  %s1496_s1 = inlined_call_operand.vmem [shape: f32[3,32], index: 1, kind: input, shape index: {}]   ;;  %s1497_s2 = inlined_call_operand.vmem [shape: f32[32,32], index: 2, kind: input, shape index: {}]   ;;  %s1498_s3 = inlined_call_operand.vmem [shape: f32[1,32], index: 3, kind: input, shape index: {}]   ;;  %s1499_s4 = inlined_call_operand.vmem [shape: f32[32,2], index: 4, kind: input, shape index: {}]   ;;  %s1500_s5 = inlined_call_operand.vmem [shape: f32[1,2], index: 5, kind: input, shape index: {}]   ;;  %s1501_s6 = inlined_call_operand.hbm [shape: f32[2,256], index: 6, kind: output, shape index: {0}]   ;;  %s1502_s7 = inlined_call_operand.hbm [shape: f32[2,2], index: 7, kind: output, shape index: {1}]  }
   0x1   :  { %v123_v0 = vld [vmem:[%s1497_s2] sm:$0xff]  ;;  %v124_v1 = vld [vmem:[%s1497_s2 + $0x8] sm:$0xff]  ;;  %1133 = vmatprep.subr.bf16.mxu1 %v1275_v3  ;;  %v125_v7 = vld [vmem:[%s1497_s2 + $0x10] sm:$0xff] }
   0x2   :  { %v29_v2 = vld [vmem:[%s1496_s1] sm:$0x7]  ;;  %v1333_v4 = vpack.c.bf16 %v124_v1, %v123_v0  ;;  %v28_v6 = vld [vmem:[%s1495_s0 + $0x8] sm:$0xff]  ;;  %v126_v8 = vld [vmem:[%s1497_s2 + $0x18] sm:$0xff] }
   0x3   :  { %1029 = vmatprep.subr.msk.mxu0 %vm44_vm0, %v29_v2  ;;  %v27_v5 = vld [vmem:[%s1495_s0] sm:$0xff] }
   0x4   :  { %1030 = vmatpush3.msk.msra.mxu0 %vm44_vm0, %v29_v2  ;;  %1031 = vmatprep.mubr.msk.f32.mxu0 %vm37_vm1, %v27_v5 }
   0x5   :  { %14 = vsyncpa [#allocation5], 0  ;;  %1135 = vmatpush3.bf16.msra.mxu1 %v1333_v4  ;;  %1032 = vmatmul.mubr.msk.f32.vlgmr.msra.gmra.mrb[0].mxu0 %vm37_vm1, %v28_v6  ;;  %v1348_v9 = vpack.c.bf16 %v126_v8, %v125_v7  ;;  %vm1276_vm2 = vmmov 0   ;;  %v1277_v10 = vmov 0.0   ;;  %v967_v13 = vld [vmem:[%s1498_s3] ss:$0 sm:$0xff] }
   0x6   :  { %1136 = vmatprep.subr.bf16.mxu1 %v1275_v3  ;;  %1042 = vmatprep.mubr.msk.f32.mxu1 %vm1276_vm2, %v1277_v10  ;;  %vm212_vm3 = vcmask 1041409   ;;  %vm127_vm4 = vcmask 261120   ;;  %s1278_s3 = smov 32   ;;  %s1279_s14 = smov 64   ;;  %vm835_vm5 = vcmask 523264   ;;  %vm837_vm6 = vcmask 785408  }
   0x7   :  { %1139 = vmatprep.subr.bf16.mxu0 %v1275_v3  ;;  %1053 = vmatprep.mubr.msk.f32.mxu0 %vm1276_vm2, %v1277_v10  ;;  %s1280_s15 = smov 96  }
   0x8   :  { %1141 = vmatpush3.bf16.msra.mxu0 %v1333_v4 }
   0x9   :  { %1138 = vmatpush3.bf16.msra.mxu1 %v1348_v9  ;;  %1142 = vmatprep.subr.bf16.mxu0 %v1275_v3 }
   0xa   :  { %1145 = vmatprep.subr.bf16.mxu1 %v1275_v3 }
   0xc   :  { %1043 = vmatmul.mubr.f32.vlgmr.msra.gmra.mrb[0].mxu1 %v1277_v10  ;;  %1144 = vmatpush3.bf16.msra.mxu0 %v1348_v9 }
   0xd   :  { %1147 = vmatpush3.bf16.msra.mxu1 %v1333_v4  ;;  %1064 = vmatprep.mubr.msk.f32.mxu1 %vm1276_vm2, %v1277_v10 }
   0xe   :  { %1148 = vmatprep.subr.bf16.mxu1 %v1275_v3  ;;  %1151 = vmatprep.subr.bf16.mxu0 %v1275_v3 }
  0x11   :  { %1150 = vmatpush3.bf16.msra.mxu1 %v1348_v9 }
  0x12   :  { %1157 = vmatprep.subr.bf16.mxu1 %v1275_v3 }
  0xd8   :  { %v1033_v11 = vpop.f32.mrb[0].mxu0 }
  0xd9   :  { %v114_v12 = vpop.f32.mrb[1].mxu0  ;;  %v1372_v14 = vadd.f32 %v1033_v11, %v967_v13 }
  0xda   :  { %v1374_v15 = vadd.f32 %v967_v13, %v114_v12 }
  0xdf   :  { %v197_v16 = vpop.f32.mrb[0].mxu1 }
  0xe0   :  { %v202_v17 = vrot.slane %v197_v16, 1  ;;  %v1044_v18 = vpop.f32.mrb[1].mxu1  ;;  %v205_v19 = vadd.f32 %v197_v16, %v1374_v15 }
  0xe2   :  { %v206_v20 = vadd.f32 %v202_v17, %v1372_v14 }
  0xe4   :  { %1195 = vtanh.f32 %v206_v20 }
  0xe5   :  { %1197 = vtanh.f32 %v205_v19 }
  0xee   :  { %v1196_v21 = vpop.eup %1195 }
  0xef   :  { %v211_v22 = vrot.slane %v1196_v21, 7  ;;  %v1198_v23 = vpop.eup %1197 }
  0xf1   :  { %v1379_v24 = vsel %vm212_vm3, %v211_v22, %v1198_v23 }
  0xf2   :  { %1054 = vmatmul.mubr.msk.f32.vlgmr.msra.gmra.mrb[2].mxu0 %vm127_vm4, %v1379_v24 }
  0xf3   :  { %1153 = vmatpush3.bf16.msra.mxu0 %v1333_v4  ;;  %1075 = vmatprep.mubr.msk.f32.mxu0 %vm1276_vm2, %v1277_v10 }
  0xf4   :  { %1154 = vmatprep.subr.bf16.mxu0 %v1275_v3 }
  0xf7   :  { %1156 = vmatpush3.bf16.msra.mxu0 %v1348_v9 }
  0xf8   :  { %1163 = vmatprep.subr.bf16.mxu0 %v1275_v3 }
 0x1c5   :  { %v282_v25 = vpop.f32.mrb[2].mxu0 }
 0x1c6   :  { %v287_v26 = vrot.slane %v282_v25, 7  ;;  %v1055_v27 = vpop.f32.mrb[3].mxu0  ;;  %v291_v29 = vadd.f32 %v282_v25, %v1372_v14 }
 0x1c8   :  { %v290_v28 = vadd.f32 %v287_v26, %v1374_v15 }
 0x1ca   :  { %1199 = vtanh.f32 %v290_v28 }
 0x1cb   :  { %1201 = vtanh.f32 %v291_v29 }
 0x1d4   :  { %v1200_v30 = vpop.eup %1199 }
 0x1d5   :  { %v296_v31 = vrot.slane %v1200_v30, 1  ;;  %v1202_v32 = vpop.eup %1201  ;;  %v855_v30 = vld [vmem:[%s1499_s4 + $0x8] sm:$0xff] }
 0x1d7   :  { %v297_v33 = vsel %vm212_vm3, %v1202_v32, %v296_v31  ;;  %v856_v31 = vld [vmem:[%s1499_s4 + $0x10] sm:$0xff] }
 0x1d8   :  { %810 = vrot.lane.b32.xlu0 %v297_v33, %s1278_s3  ;;  %1065 = vmatmul.mubr.msk.f32.vlgmr.msra.gmra.mrb[2].mxu1 %vm127_vm4, %v297_v33  ;;  %v857_v33 = vld [vmem:[%s1499_s4 + $0x18] sm:$0xff] }
 0x1d9   :  { %1159 = vmatpush3.bf16.msra.mxu1 %v1333_v4  ;;  %1086 = vmatprep.mubr.msk.f32.mxu1 %vm1276_vm2, %v1277_v10 }
 0x1da   :  { %1160 = vmatprep.subr.bf16.mxu1 %v1275_v3 }
 0x1dd   :  { %1162 = vmatpush3.bf16.msra.mxu1 %v1348_v9 }
 0x1de   :  { %1169 = vmatprep.subr.bf16.mxu1 %v1275_v3 }
 0x2ab   :  { %v366_v34 = vpop.f32.mrb[2].mxu1 }
 0x2ac   :  { %v371_v35 = vrot.slane %v366_v34, 6  ;;  %v372_v36 = vrot.slane %v366_v34, 7  ;;  %v1066_v37 = vpop.f32.mrb[3].mxu1  ;;  %v1185_v34 = vpack.c.bf16 %v857_v33, %v856_v31 }
 0x2ae   :  { %v375_v38 = vadd.f32 %v371_v35, %v1374_v15  ;;  %v376_v39 = vadd.f32 %v372_v36, %v1372_v14 }
 0x2b0   :  { %1203 = vtanh.f32 %v375_v38 }
 0x2b1   :  { %1205 = vtanh.f32 %v376_v39 }
 0x2ba   :  { %v1204_v40 = vpop.eup %1203 }
 0x2bb   :  { %v1206_v41 = vpop.eup %1205  ;;  %v381_v42 = vrot.slane %v1204_v40, 2 }
 0x2bc   :  { %v382_v43 = vrot.slane %v1206_v41, 1 }
 0x2be   :  { %v383_v44 = vsel %vm212_vm3, %v382_v43, %v381_v42 }
 0x2bf   :  { %813 = vrot.lane.b32.xlu1 %v383_v44, %s1279_s14  ;;  %1076 = vmatmul.mubr.msk.f32.vlgmr.msra.gmra.mrb[4].mxu0 %vm127_vm4, %v383_v44 }
 0x2c0   :  { %1165 = vmatpush3.bf16.msra.mxu0 %v1333_v4  ;;  %1097 = vmatprep.mubr.msk.f32.mxu0 %vm1276_vm2, %v1277_v10 }
 0x2c1   :  { %1166 = vmatprep.subr.bf16.mxu0 %v1275_v3 }
 0x2c4   :  { %1168 = vmatpush3.bf16.msra.mxu0 %v1348_v9 }
 0x2c5   :  { %1175 = vmatprep.subr.bf16.mxu0 %v1275_v3 }
 0x392   :  { %v452_v45 = vpop.f32.mrb[4].mxu0 }
 0x393   :  { %v457_v46 = vrot.slane %v452_v45, 5  ;;  %v458_v47 = vrot.slane %v452_v45, 6  ;;  %v1077_v48 = vpop.f32.mrb[5].mxu0 }
 0x395   :  { %v461_v49 = vadd.f32 %v457_v46, %v1374_v15  ;;  %v462_v50 = vadd.f32 %v458_v47, %v1372_v14  ;;  %v814_v46 = vpop.permute.xlu1 %813 }
 0x397   :  { %1207 = vtanh.f32 %v461_v49 }
 0x398   :  { %1209 = vtanh.f32 %v462_v50 }
 0x3a1   :  { %v1208_v51 = vpop.eup %1207 }
 0x3a2   :  { %v1210_v52 = vpop.eup %1209  ;;  %v467_v53 = vrot.slane %v1208_v51, 3 }
 0x3a3   :  { %v468_v54 = vrot.slane %v1210_v52, 2 }
 0x3a5   :  { %v469_v55 = vsel %vm212_vm3, %v468_v54, %v467_v53 }
 0x3a6   :  { %1087 = vmatmul.mubr.msk.f32.vlgmr.msra.gmra.mrb[4].mxu1 %vm127_vm4, %v469_v55 }
 0x3a7   :  { %1171 = vmatpush3.bf16.msra.mxu1 %v1333_v4  ;;  %1108 = vmatprep.mubr.msk.f32.mxu1 %vm1276_vm2, %v1277_v10 }
 0x3a8   :  { %1172 = vmatprep.subr.bf16.mxu1 %v1275_v3 }
 0x3ab   :  { %1174 = vmatpush3.bf16.msra.mxu1 %v1348_v9 }
 0x3ac   :  { %1181 = vmatprep.subr.bf16.mxu1 %v1275_v3 }
 0x479   :  { %v538_v56 = vpop.f32.mrb[4].mxu1 }
 0x47a   :  { %v543_v57 = vrot.slane %v538_v56, 4  ;;  %v544_v58 = vrot.slane %v538_v56, 5  ;;  %v1088_v59 = vpop.f32.mrb[5].mxu1 }
 0x47c   :  { %v547_v60 = vadd.f32 %v543_v57, %v1374_v15  ;;  %v548_v61 = vadd.f32 %v544_v58, %v1372_v14 }
 0x47e   :  { %1211 = vtanh.f32 %v547_v60 }
 0x47f   :  { %1213 = vtanh.f32 %v548_v61 }
 0x488   :  { %v1212_v62 = vpop.eup %1211 }
 0x489   :  { %v1214_v63 = vpop.eup %1213  ;;  %v553_v0 = vrot.slane %v1212_v62, 4 }
 0x48a   :  { %v554_v1 = vrot.slane %v1214_v63, 3 }
 0x48c   :  { %v1424_v2 = vsel %vm212_vm3, %v554_v1, %v553_v0 }
 0x48d   :  { %1098 = vmatmul.mubr.msk.f32.vlgmr.msra.gmra.mrb[6].mxu0 %vm127_vm4, %v1424_v2 }
 0x48e   :  { %1177 = vmatpush3.bf16.msra.mxu0 %v1333_v4  ;;  %1119 = vmatprep.mubr.msk.f32.mxu0 %vm1276_vm2, %v1277_v10 }
 0x48f   :  { %1178 = vmatprep.subr.bf16.mxu0 %v1275_v3 }
 0x492   :  { %1180 = vmatpush3.bf16.msra.mxu0 %v1348_v9 }
 0x560   :  { %v624_v5 = vpop.f32.mrb[6].mxu0 }
 0x561   :  { %v629_v6 = vrot.slane %v624_v5, 3  ;;  %v630_v7 = vrot.slane %v624_v5, 4  ;;  %v1099_v8 = vpop.f32.mrb[7].mxu0 }
 0x563   :  { %v633_v11 = vadd.f32 %v629_v6, %v1374_v15  ;;  %v634_v12 = vadd.f32 %v630_v7, %v1372_v14 }
 0x565   :  { %1215 = vtanh.f32 %v633_v11 }
 0x566   :  { %1217 = vtanh.f32 %v634_v12 }
 0x56f   :  { %v1216_v13 = vpop.eup %1215 }
 0x570   :  { %v1218_v16 = vpop.eup %1217  ;;  %v639_v4 = vrot.slane %v1216_v13, 5 }
 0x571   :  { %v640_v17 = vrot.slane %v1218_v16, 4 }
 0x573   :  { %v641_v18 = vsel %vm212_vm3, %v640_v17, %v639_v4 }
 0x574   :  { %820 = vrot.lane.b32.xlu0 %v641_v18, %s1278_s3  ;;  %1109 = vmatmul.mubr.msk.f32.vlgmr.msra.gmra.mrb[6].mxu1 %vm127_vm4, %v641_v18 }
 0x575   :  { %1130 = vmatprep.mubr.msk.f32.mxu1 %vm1276_vm2, %v1277_v10  ;;  %v854_v10 = vld [vmem:[%s1499_s4] sm:$0xff]  ;;  %s1281_s4 = smov [#allocation2]  }
 0x576   :  { %v1182_v32 = vpack.c.bf16 %v855_v30, %v854_v10  ;;  %s945_s24 = sshll.u32 %s1281_s4, 4  ;;  %s946_s24 = int_to_ptr.vmem [resolvable:$true] %s945_s24 }
 0x577   :  { %s1227_s25 = scalar_lea.vmem %s946_s24, 64  ;;  %p1232_p1 = scmp.lt.s32.totalorder %s946_s24, %s946_s24 }
 0x578   :  { %816 = vrot.lane.b32.xlu0 %v469_v55, %s1280_s15  ;;  %1183 = vmatpush3.bf16.msra.mxu1 %v1182_v32  ;;  %p1228_p0 = scmp.ne.s32.totalorder %s946_s24, %s1227_s25  ;;  %p1233_p2 = scmp.lt.s32.totalorder %s1227_s25, %s1227_s25 }
 0x579   :  { %1184 = vmatprep.subr.bf16.mxu1 %v1275_v3  ;;  %v811_v3 = vpop.permute.xlu0 %810 }
 0x57a   :  { %p1234_p3 = por %p1233_p2, %p1232_p1 }
 0x57c   :  { %1186 = vmatpush3.bf16.msra.mxu1 %v1185_v34  ;;  %p1235_p4 = pnand %p1234_p3, %p1228_p0 }
 0x5e6   :  { %v821_v47 = vpop.permute.xlu0 %820 }
 0x5e7   :  { %v839_v49 = vsel %vm127_vm4, %v1424_v2, %v821_v47 }
 0x647   :  { %v710_v9 = vpop.f32.mrb[6].mxu1 }
 0x648   :  { %v715_v19 = vrot.slane %v710_v9, 2  ;;  %v716_v20 = vrot.slane %v710_v9, 3  ;;  %v1110_v21 = vpop.f32.mrb[7].mxu1 }
 0x64a   :  { %v719_v22 = vadd.f32 %v715_v19, %v1374_v15  ;;  %v720_v23 = vadd.f32 %v716_v20, %v1372_v14 }
 0x64c   :  { %1219 = vtanh.f32 %v719_v22 }
 0x64d   :  { %1221 = vtanh.f32 %v720_v23 }
 0x656   :  { %v1220_v25 = vpop.eup %1219 }
 0x657   :  { %v1222_v26 = vpop.eup %1221  ;;  %v725_v27 = vrot.slane %v1220_v25, 6 }
 0x658   :  { %v726_v28 = vrot.slane %v1222_v26, 5 }
 0x65a   :  { %v727_v29 = vsel %vm212_vm3, %v726_v28, %v725_v27 }
 0x65b   :  { %823 = vrot.lane.b32.xlu1 %v727_v29, %s1279_s14  ;;  %1120 = vmatmul.mubr.msk.f32.vlgmr.msra.gmra.mrb[8].mxu0 %vm127_vm4, %v727_v29 }
 0x6cd   :  { %v824_v48 = vpop.permute.xlu1 %823 }
 0x6ce   :  { %v840_v51 = vsel %vm835_vm5, %v839_v49, %v824_v48 }
 0x72e   :  { %v796_v35 = vpop.f32.mrb[8].mxu0 }
 0x72f   :  { %v801_v36 = vrot.slane %v796_v35, 1  ;;  %v802_v37 = vrot.slane %v796_v35, 2  ;;  %v1121_v38 = vpop.f32.mrb[9].mxu0 }
 0x731   :  { %v805_v39 = vadd.f32 %v801_v36, %v1374_v15  ;;  %v806_v40 = vadd.f32 %v802_v37, %v1372_v14  ;;  %v817_v15 = vpop.permute.xlu0 %816  ;;  %v834_v14 = vsel %vm127_vm4, %v1379_v24, %v811_v3 }
 0x732   :  { %v836_v50 = vsel %vm835_vm5, %v834_v14, %v814_v46 }
 0x733   :  { %1223 = vtanh.f32 %v805_v39  ;;  %v838_v53 = vsel %vm837_vm6, %v836_v50, %v817_v15 }
 0x734   :  { %1225 = vtanh.f32 %v806_v40 }
 0x73d   :  { %v1224_v41 = vpop.eup %1223 }
 0x73e   :  { %v1226_v42 = vpop.eup %1225  ;;  %v828_v43 = vrot.slane %v1224_v41, 7 }
 0x73f   :  { %v829_v44 = vrot.slane %v1226_v42, 6 }
 0x741   :  { %v830_v45 = vsel %vm212_vm3, %v829_v44, %v828_v43 }
 0x742   :  { %831 = vrot.lane.b32.xlu1 %v830_v45, %s1280_s15  ;;  %1131 = vmatmul.mubr.msk.f32.vlgmr.msra.gmra.mrb[8].mxu1 %vm127_vm4, %v830_v45 }
 0x7b4   :  { %v832_v52 = vpop.permute.xlu1 %831 }
 0x7b5   :  { %v841_v54 = vsel %vm837_vm6, %v840_v51, %v832_v52 }
 0x7b6   :  { %v844_v55 = vcombine.low %v838_v53, %v841_v54 }
 0x7b8   :  { %978 = vst.sshfl [vmem:[#allocation2] sm:$0x33 pattern:$0x76325410] %v844_v55 }
 0x7b9   :  { %1238 = shalt.err (!%p1235_p4)
}
 0x7ba   :  { %s1239_s28 = scalar_lea.hbm %s1501_s6, 64 }
 0x7bb   :  { %p1240_p5 = scmp.ne.s32.totalorder %s1501_s6, %s1239_s28  ;;  %p1243_p6 = scmp.lt.u32.totalorder %s1239_s28, %s1501_s6 }
 0x7bd   :  { %p1245_p7 = pnand %p1243_p6, %p1240_p5 }
 0x7bf   :  { %1248 = shalt.err (!%p1245_p7)
}
 0x7c0   :  { %948 = dma.vmem_to_hbm [thread:$0]  %s946_s24, 64, %s1501_s6, [#allocation3]   ;;  %v979_v24 = vld [vmem:[%s1500_s5] ss:$0 sm:$0xff]  ;;  %vm937_vm7 = vcmask 9216  }
 0x7c1   :  { %s1282_s13 = smov [#allocation4]  }
 0x7c2   :  { %s955_s0 = sshll.u32 %s1282_s13, 4  ;;  %s956_s0 = int_to_ptr.vmem [resolvable:$true] %s955_s0 }
 0x7c3   :  { %s1249_s2 = scalar_lea.vmem %s956_s0, 32  ;;  %p1254_p9 = scmp.lt.s32.totalorder %s956_s0, %s956_s0 }
 0x7c4   :  { %p1250_p8 = scmp.ne.s32.totalorder %s956_s0, %s1249_s2  ;;  %p1255_p10 = scmp.lt.s32.totalorder %s1249_s2, %s1249_s2 }
 0x7c6   :  { %p1256_p11 = por %p1255_p10, %p1254_p9 }
 0x7c8   :  { %p1257_p12 = pnand %p1256_p11, %p1250_p8 }
 0x815   :  { %v933_v56 = vpop.f32.mrb[8].mxu1 }
 0x816   :  { %v934_v57 = vadd.f32 %v979_v24, %v933_v56  ;;  %v1132_v58 = vpop.f32.mrb[9].mxu1 }
 0x818   :  { %938 = vst.msk [vmem:[#allocation4] sm:$0x3] %vm937_vm7, %v934_v57 }
 0x819   :  { %1260 = shalt.err (!%p1257_p12)
}
 0x81a   :  { %s1261_s14 = scalar_lea.hbm %s1502_s7, 32 }
 0x81b   :  { %p1262_p13 = scmp.ne.s32.totalorder %s1502_s7, %s1261_s14  ;;  %p1265_p0 = scmp.lt.u32.totalorder %s1261_s14, %s1502_s7 }
 0x81d   :  { %p1267_p1 = pnand %p1265_p0, %p1262_p13 }
 0x81f   :  { %1270 = shalt.err (!%p1267_p1)
}
 0x820   :  { %958 = dma.vmem_to_hbm [thread:$0]  %s956_s0, 32, %s1502_s7, [#allocation5]  }
 0x821   :  { %1271 = dma.done.wait [#allocation3], 64  }
 0x822   :  { %1272 = vsyncadd [#allocation3], 4294967232 }
 0x823   :  { %1273 = dma.done.wait [#allocation5], 32  }
 0x824   :  { %1274 = vsyncadd [#allocation5], 4294967264 }
 0x825   :  { %965 = vsyncpa [#allocation3], 1 }
 0x826   :  { %966 = vsyncpa [#allocation5], 1 }

</bundles_post_ra>
